<compile_context>
chip_gen: v7x
topology: tpu7x:2x2x1
jax: 0.10.0
libtpu: 0.0.40
codegen_flags: <defaults>
</compile_context>

<pallas_src>
import functools

import jax
import jax.numpy as jnp
from jax.experimental import pallas as pl
from jax.experimental.pallas import tpu as pltpu


def _hbm_copy_kernel(x_hbm, o_hbm, sems, *, chunk_bounds):
    """Whole BaseCNN forward: identity, done as chunked HBM->HBM DMAs."""
    copies = []
    for idx, (start, size) in enumerate(chunk_bounds):
        cp = pltpu.make_async_copy(
            x_hbm.at[pl.ds(start, size)],
            o_hbm.at[pl.ds(start, size)],
            sems.at[idx],
        )
        cp.start()
        copies.append(cp)
    # Overlap: all DMAs are in flight before we wait on any of them.
    for cp in copies:
        cp.wait()


def base_cnn_forward(x):
    """Forward pass of BaseCNN: identity on x (any shape, any dtype)."""
    orig_shape = x.shape
    if x.size == 0:
        return x

    # 0-d input: give it a leading axis to slice over (free reshape).
    squeeze_back = False
    if x.ndim == 0:
        x = x.reshape(1)
        squeeze_back = True

    n = x.size
    itemsize = jnp.dtype(x.dtype).itemsize
    total_bytes = n * itemsize

    # 1 DMA for small arrays; up to 4 large chunks along the leading axis for
    # big ones so multiple DMA engines can overlap.  All split points are
    # static Python ints (shape is static), so no runtime index math.
    dim0 = x.shape[0]
    if total_bytes <= (1 << 20) or dim0 <= 1:
        num_chunks = 1
    else:
        num_chunks = min(4, dim0)

    base, rem = divmod(dim0, num_chunks)
    chunk_bounds = []
    start = 0
    for c in range(num_chunks):
        size = base + (1 if c < rem else 0)
        chunk_bounds.append((start, size))
        start += size

    kernel = functools.partial(
        _hbm_copy_kernel, chunk_bounds=tuple(chunk_bounds)
    )

    out = pl.pallas_call(
        kernel,
        out_shape=jax.ShapeDtypeStruct(x.shape, x.dtype),
        in_specs=[pl.BlockSpec(memory_space=pl.ANY)],
        out_specs=pl.BlockSpec(memory_space=pl.ANY),
        scratch_shapes=[pltpu.SemaphoreType.DMA((num_chunks,))],
        cost_estimate=pl.CostEstimate(
            flops=0, transcendentals=0, bytes_accessed=2 * total_bytes
        ),
    )(x)

    if squeeze_back:
        out = out.reshape(orig_shape)
    return out


if __name__ == "__main__":
    # Deterministic small input consistent with an NCHW image batch.
    key = jax.random.PRNGKey(0)
    x = jax.random.normal(key, (2, 4, 16, 16), dtype=jnp.float32)  # NCHW

    y = base_cnn_forward(x)
    y = jax.block_until_ready(y)

    # BaseCNN.forward is identity: verify exact match.
    assert y.shape == x.shape and y.dtype == x.dtype
    assert bool(jnp.all(y == x))

    print("KERNEL_OK")
</pallas_src>

<mosaic_0001>
module attributes {stable_mosaic.version = 11 : i64} {
  func.func @_hbm_copy_kernel(%arg0: memref<2x4x16x16xf32, #tpu.memory_space<any>>, %arg1: memref<2x4x16x16xf32, #tpu.memory_space<any>>, %arg2: memref<1x!tpu.dma_semaphore, #tpu.memory_space<semaphore_mem>>) attributes {dimension_semantics = [], scalar_prefetch = 0 : i64, scratch_operands = 1 : i64, tpu.core_type = #tpu.core_type<tc>} {
    %c0_i32 = arith.constant 0 : i32
    %c0_i32_0 = arith.constant 0 : i32
    %c0_i32_1 = arith.constant 0 : i32
    %c0_i32_2 = arith.constant 0 : i32
    %c0_i32_3 = arith.constant 0 : i32
    %0 = tpu.memref_slice %arg0[%c0_i32_0, %c0_i32_1, %c0_i32_2, %c0_i32_3] : memref<2x4x16x16xf32, #tpu.memory_space<any>> -> memref<2x4x16x16xf32, #tpu.memory_space<any>>
    %c0_i32_4 = arith.constant 0 : i32
    %c0_i32_5 = arith.constant 0 : i32
    %c0_i32_6 = arith.constant 0 : i32
    %c0_i32_7 = arith.constant 0 : i32
    %1 = tpu.memref_slice %arg1[%c0_i32_4, %c0_i32_5, %c0_i32_6, %c0_i32_7] : memref<2x4x16x16xf32, #tpu.memory_space<any>> -> memref<2x4x16x16xf32, #tpu.memory_space<any>>
    %2 = tpu.memref_slice %arg2[%c0_i32] : memref<1x!tpu.dma_semaphore, #tpu.memory_space<semaphore_mem>> -> memref<1x!tpu.dma_semaphore, #tpu.memory_space<semaphore_mem>>
    %3 = tpu.memref_squeeze %2 : memref<1x!tpu.dma_semaphore, #tpu.memory_space<semaphore_mem>> -> memref<!tpu.dma_semaphore, #tpu.memory_space<semaphore_mem>>
    tpu.enqueue_dma source(%0 : memref<2x4x16x16xf32, #tpu.memory_space<any>>) target(%1 : memref<2x4x16x16xf32, #tpu.memory_space<any>>) target_semaphore(%3 : memref<!tpu.dma_semaphore, #tpu.memory_space<semaphore_mem>>)
    %c0_i32_8 = arith.constant 0 : i32
    %c0_i32_9 = arith.constant 0 : i32
    %c0_i32_10 = arith.constant 0 : i32
    %c0_i32_11 = arith.constant 0 : i32
    %c0_i32_12 = arith.constant 0 : i32
    %4 = tpu.memref_slice %arg0[%c0_i32_9, %c0_i32_10, %c0_i32_11, %c0_i32_12] : memref<2x4x16x16xf32, #tpu.memory_space<any>> -> memref<2x4x16x16xf32, #tpu.memory_space<any>>
    %c0_i32_13 = arith.constant 0 : i32
    %c0_i32_14 = arith.constant 0 : i32
    %c0_i32_15 = arith.constant 0 : i32
    %c0_i32_16 = arith.constant 0 : i32
    %5 = tpu.memref_slice %arg1[%c0_i32_13, %c0_i32_14, %c0_i32_15, %c0_i32_16] : memref<2x4x16x16xf32, #tpu.memory_space<any>> -> memref<2x4x16x16xf32, #tpu.memory_space<any>>
    %6 = tpu.memref_slice %arg2[%c0_i32_8] : memref<1x!tpu.dma_semaphore, #tpu.memory_space<semaphore_mem>> -> memref<1x!tpu.dma_semaphore, #tpu.memory_space<semaphore_mem>>
    %7 = tpu.memref_squeeze %6 : memref<1x!tpu.dma_semaphore, #tpu.memory_space<semaphore_mem>> -> memref<!tpu.dma_semaphore, #tpu.memory_space<semaphore_mem>>
    tpu.wait_dma2 semaphore(%7 : memref<!tpu.dma_semaphore, #tpu.memory_space<semaphore_mem>>) src(%4 : memref<2x4x16x16xf32, #tpu.memory_space<any>>) dst(%5 : memref<2x4x16x16xf32, #tpu.memory_space<any>>)
    return
  }
}

</mosaic_0001>

<bundles_post_ra>
// kernel: tpu_custom_call.1
= control target key start
LH: loop header
LB: loop body
LE: loop exit
PB: predicated region body
PF: predicated region fallthrough
CT: control target
= control target key end

     0   :  { %s36_s6 = smov [#allocation2]   ;;  %s37_s7 = smov [#allocation3]   ;;  %s55_s0 = inlined_call_operand.hbm [shape: f32[2,4,16,16], index: 0, kind: input, shape index: {}]   ;;  %s56_s1 = inlined_call_operand.hbm [shape: f32[2,4,16,16], index: 1, kind: output, shape index: {}]  }
   0x1   :  { %s38_s8 = smov 0  }
   0x2   :  { %18 = dma.general %s55_s0, 2048, %s56_s1, %s36_s6, %s37_s7, [#allocation4], %s38_s8, 0  }
   0x3   :  { %34 = dma.done.wait [#allocation2], 2048 }
   0x4   :  { %35 = vsyncadd [#allocation2], 4294965248 }
   0x5   :  { %24 = vsyncmov [#allocation2] }
   0x8   :  { %s25_s13 = vpop.sfrf %24 }
   0x9   :  { %p30_p0 = scmp.ne.s32.totalorder %s25_s13, 0 }
   0xb   :  { %29 = shalt.err (%p30_p0)  }

</bundles_post_ra>
